<compile_context>
chip_gen: v6e
topology: v6e:2x2x1
jax: 0.10.0
libtpu: 0.0.40
codegen_flags: <defaults>
</compile_context>

<pallas_src>
import functools

import jax
import jax.numpy as jnp
from jax.experimental import pallas as pl
from jax.experimental.pallas import tpu as pltpu


def _round_up(x, m):
    return ((x + m - 1) // m) * m


def _focal_loss_kernel(logits_ref, labels_ref, mask_ref, out_ref,
                       row_sy, row_sm, acc_num, acc_den, *, gamma, alpha):
    i = pl.program_id(0)
    j = pl.program_id(1)
    ni = pl.num_programs(0)
    nj = pl.num_programs(1)

    # Global (grid-resident) accumulators: zero once at the very first step.
    @pl.when(jnp.logical_and(i == 0, j == 0))
    def _():
        acc_num[...] = jnp.zeros_like(acc_num)
        acc_den[...] = jnp.zeros_like(acc_den)

    # Per-row partial sums for the current row tile: zero at the start of
    # every sweep over the S (reduction) axis.
    @pl.when(j == 0)
    def _():
        row_sy[...] = jnp.zeros_like(row_sy)
        row_sm[...] = jnp.zeros_like(row_sm)

    # Stream labels/mask in their native (narrow) dtype; cast per tile.
    m = mask_ref[...].astype(jnp.float32)                    # [TR, TS]
    y = labels_ref[...].astype(jnp.float32)                  # [TR, TS]
    row_sy[...] += jnp.sum(m * y, axis=1, keepdims=True)     # [TR, 1]
    row_sm[...] += jnp.sum(m, axis=1, keepdims=True)         # [TR, 1]

    # After the last S tile of this row tile: the per-element focal loss only
    # takes two values per row (y=0 or y=1) since the logit is constant across
    # S.  Compute L0/L1 once per row and combine with the streamed counts.
    @pl.when(j == nj - 1)
    def _():
        x = logits_ref[...].astype(jnp.float32)              # [TR, 1]
        relu_x = jnp.maximum(x, 0.0)
        log_term = jnp.log1p(jnp.exp(-jnp.abs(x)))           # stable BCE pieces
        bce1 = relu_x - x + log_term                         # BCE when y == 1
        bce0 = relu_x + log_term                             # BCE when y == 0
        pt1 = jnp.exp(-bce1)
        pt0 = jnp.exp(-bce0)
        w1 = (1.0 - pt1) ** gamma                            # integer_pow for int gamma
        w0 = (1.0 - pt0) ** gamma
        if alpha is not None:
            l1 = jnp.float32(alpha[1]) * w1 * bce1
            l0 = jnp.float32(alpha[0]) * w0 * bce0
        else:
            l1 = w1 * bce1
            l0 = w0 * bce0
        sy = row_sy[...]
        sm = row_sm[...]
        acc_num[...] += l1 * sy + l0 * (sm - sy)              # elementwise adds only
        acc_den[...] += sm

    # Final grid point: one cross-sublane reduction + the scalar store.
    @pl.when(jnp.logical_and(i == ni - 1, j == nj - 1))
    def _():
        num = jnp.sum(acc_num[...], keepdims=True)            # (1, 1)
        den = jnp.sum(acc_den[...], keepdims=True)            # (1, 1)
        out_ref[...] = num / (den + 1e-8)


def focal_loss(logits, labels, mask, *, gamma=2, alpha=None,
               tile_r=None, tile_s=None):
    """Pallas implementation of FocalLoss.forward.

    logits: [B, C] float
    labels: [B, C, H, W] binary values (any numeric dtype; NOT upcast here)
    mask:   [B, C, H, W] weights (any numeric dtype; NOT upcast here)
    Returns a scalar f32 loss.
    """
    B, C = logits.shape
    H, W = labels.shape[-2], labels.shape[-1]
    R, S = B * C, H * W

    logits2d = logits.reshape(R, 1).astype(jnp.float32)
    labels2d = labels.reshape(R, S)          # keep native narrow dtype
    mask2d = mask.reshape(R, S)              # keep native narrow dtype

    # Integer gamma -> integer_pow (x*x for gamma=2) rather than EUP float pow.
    gf = float(gamma)
    gamma = int(gf) if gf.is_integer() else gf

    # Tile selection: lane tiles up to 2048, row tiles capped so a single
    # labels/mask tile stays <= ~2 MiB, so 2 inputs x 2 pipeline buffers stays
    # well under the 16 MiB default scoped VMEM on v5e (and v6e/v7x limits).
    itemsize = max(jnp.dtype(labels2d.dtype).itemsize,
                   jnp.dtype(mask2d.dtype).itemsize)
    max_tile_elems = (2 * 1024 * 1024) // itemsize
    if tile_s is None:
        tile_s = min(_round_up(S, 128), 2048)
    if tile_r is None:
        r_cap = max(8, (max_tile_elems // tile_s) // 8 * 8)
        tile_r = min(_round_up(R, 8), min(512, r_cap))

    # Zero-pad ragged edges; zero mask rows/lanes contribute 0 to num and den.
    R_pad = _round_up(R, tile_r)
    S_pad = _round_up(S, tile_s)
    if (R_pad, S_pad) != (R, S):
        labels2d = jnp.pad(labels2d, ((0, R_pad - R), (0, S_pad - S)))
        mask2d = jnp.pad(mask2d, ((0, R_pad - R), (0, S_pad - S)))
        logits2d = jnp.pad(logits2d, ((0, R_pad - R), (0, 0)))

    nr, ns = R_pad // tile_r, S_pad // tile_s
    kernel = functools.partial(_focal_loss_kernel, gamma=gamma, alpha=alpha)

    out = pl.pallas_call(
        kernel,
        out_shape=jax.ShapeDtypeStruct((1, 1), jnp.float32),
        grid=(nr, ns),
        in_specs=[
            pl.BlockSpec((tile_r, 1), lambda i, j: (i, 0)),
            pl.BlockSpec((tile_r, tile_s), lambda i, j: (i, j)),
            pl.BlockSpec((tile_r, tile_s), lambda i, j: (i, j)),
        ],
        out_specs=pl.BlockSpec((1, 1), lambda i, j: (0, 0)),
        scratch_shapes=[
            pltpu.VMEM((tile_r, 1), jnp.float32),   # row_sy: sum(mask*label) per row
            pltpu.VMEM((tile_r, 1), jnp.float32),   # row_sm: sum(mask) per row
            pltpu.VMEM((tile_r, 1), jnp.float32),   # acc_num partials
            pltpu.VMEM((tile_r, 1), jnp.float32),   # acc_den partials
        ],
        compiler_params=pltpu.CompilerParams(
            dimension_semantics=("arbitrary", "arbitrary")),
    )(logits2d, labels2d, mask2d)
    return out[0, 0]


def _focal_loss_ref(logits, labels, mask, *, gamma=2, alpha=None):
    # Pure-JAX reference mirroring the PyTorch forward (per-element form).
    x = jnp.broadcast_to(logits[..., None, None],
                         labels.shape).reshape(-1).astype(jnp.float32)
    y = labels.reshape(-1).astype(jnp.float32)
    m = mask.reshape(-1).astype(jnp.float32)
    bce = jnp.maximum(x, 0.0) - x * y + jnp.log1p(jnp.exp(-jnp.abs(x)))
    pt = jnp.exp(-bce)
    if alpha is not None:
        alpha_t = jnp.where(y == 1.0, alpha[1], alpha[0])
        fl = alpha_t * (1.0 - pt) ** gamma * bce
    else:
        fl = (1.0 - pt) ** gamma * bce
    return jnp.sum(fl * m) / (jnp.sum(m) + 1e-8)


if __name__ == "__main__":
    key = jax.random.PRNGKey(0)

    def make(bkey, B, C, H, W):
        k1, k2, k3 = jax.random.split(bkey, 3)
        logits = jax.random.normal(k1, (B, C), dtype=jnp.float32)
        # Narrow (int8) labels/mask -> 4x fewer HBM bytes streamed by the kernel.
        labels = jax.random.bernoulli(k2, 0.3, (B, C, H, W)).astype(jnp.int8)
        mask = jax.random.bernoulli(k3, 0.8, (B, C, H, W)).astype(jnp.int8)
        return logits, labels, mask

    k0, k1, k2 = jax.random.split(key, 3)

    # Case 1: base case (gamma=2, no alpha), aligned shapes (single tile).
    logits, labels, mask = make(k0, 2, 4, 16, 16)
    out1 = jax.block_until_ready(focal_loss(logits, labels, mask, gamma=2))
    ref1 = _focal_loss_ref(logits, labels, mask, gamma=2)
    assert jnp.isfinite(out1), "non-finite loss"
    assert jnp.allclose(out1, ref1, rtol=1e-5, atol=1e-5), (out1, ref1)

    # Case 2: alpha class weighting.
    out2 = jax.block_until_ready(
        focal_loss(logits, labels, mask, gamma=2, alpha=(0.25, 0.75)))
    ref2 = _focal_loss_ref(logits, labels, mask, gamma=2, alpha=(0.25, 0.75))
    assert jnp.allclose(out2, ref2, rtol=1e-5, atol=1e-5), (out2, ref2)

    # Case 3: ragged shapes + forced small tiles -> multi-tile reduction grid
    # with row (6->8) and lane (400->512) zero-padding.
    logits3, labels3, mask3 = make(k2, 3, 2, 20, 20)
    out3 = jax.block_until_ready(
        focal_loss(logits3, labels3, mask3, gamma=2, tile_r=8, tile_s=128))
    ref3 = _focal_loss_ref(logits3, labels3, mask3, gamma=2)
    assert jnp.allclose(out3, ref3, rtol=1e-5, atol=1e-5), (out3, ref3)

    print("KERNEL_OK")
</pallas_src>

<mosaic_0001>
module attributes {stable_mosaic.version = 11 : i64} {
  func.func @_focal_loss_kernel(%arg0: i32, %arg1: i32, %arg2: memref<8x1xf32, #tpu.memory_space<vmem>>, %arg3: memref<8x256xi8, #tpu.memory_space<vmem>>, %arg4: memref<8x256xi8, #tpu.memory_space<vmem>>, %arg5: memref<1x1xf32, #tpu.memory_space<vmem>>, %arg6: memref<8x1xf32, #tpu.memory_space<vmem>>, %arg7: memref<8x1xf32, #tpu.memory_space<vmem>>, %arg8: memref<8x1xf32, #tpu.memory_space<vmem>>, %arg9: memref<8x1xf32, #tpu.memory_space<vmem>>) attributes {dimension_semantics = [#tpu.dimension_semantics<arbitrary>, #tpu.dimension_semantics<arbitrary>], iteration_bounds = array<i64: 1, 1>, scalar_prefetch = 0 : i64, scratch_operands = 4 : i64, tpu.core_type = #tpu.core_type<tc>, window_params = [{transform_indices = @transform_0, window_bounds = array<i64: 8, 1>}, {transform_indices = @transform_1, window_bounds = array<i64: 8, 256>}, {transform_indices = @transform_2, window_bounds = array<i64: 8, 256>}, {pipeline_mode = #tpu.pipeline_mode<synchronous>, transform_indices = @transform_3, window_bounds = array<i64: 1, 1>}]} {
    %c0_i32 = arith.constant 0 : i32
    %0 = arith.cmpi eq, %arg0, %c0_i32 : i32
    %c0_i32_0 = arith.constant 0 : i32
    %1 = arith.cmpi eq, %arg1, %c0_i32_0 : i32
    %2 = arith.andi %0, %1 : i1
    %3 = arith.extui %2 : i1 to i32
    %c0_i32_1 = arith.constant 0 : i32
    %4 = arith.cmpi ne, %3, %c0_i32_1 : i32
    scf.if %4 {
      %cst_21 = arith.constant 0.000000e+00 : f32
      %31 = vector.broadcast %cst_21 : f32 to vector<8x1xf32>
      %c0_22 = arith.constant 0 : index
      %c0_23 = arith.constant 0 : index
      %32 = vector.load %arg8[%c0_22, %c0_23] : memref<8x1xf32, #tpu.memory_space<vmem>>, vector<8x1xf32>
      tpu.vector_store %arg8[%c0_22, %c0_23], %31 {strides = array<i32>} : memref<8x1xf32, #tpu.memory_space<vmem>>, vector<8x1xf32>,
      %cst_24 = arith.constant 0.000000e+00 : f32
      %33 = vector.broadcast %cst_24 : f32 to vector<8x1xf32>
      %c0_25 = arith.constant 0 : index
      %c0_26 = arith.constant 0 : index
      %34 = vector.load %arg9[%c0_25, %c0_26] : memref<8x1xf32, #tpu.memory_space<vmem>>, vector<8x1xf32>
      tpu.vector_store %arg9[%c0_25, %c0_26], %33 {strides = array<i32>} : memref<8x1xf32, #tpu.memory_space<vmem>>, vector<8x1xf32>,
    } else {
    }
    %c0_i32_2 = arith.constant 0 : i32
    %5 = arith.cmpi eq, %arg1, %c0_i32_2 : i32
    %6 = arith.extui %5 : i1 to i32
    %c0_i32_3 = arith.constant 0 : i32
    %7 = arith.cmpi ne, %6, %c0_i32_3 : i32
    scf.if %7 {
      %cst_21 = arith.constant 0.000000e+00 : f32
      %31 = vector.broadcast %cst_21 : f32 to vector<8x1xf32>
      %c0_22 = arith.constant 0 : index
      %c0_23 = arith.constant 0 : index
      %32 = vector.load %arg6[%c0_22, %c0_23] : memref<8x1xf32, #tpu.memory_space<vmem>>, vector<8x1xf32>
      tpu.vector_store %arg6[%c0_22, %c0_23], %31 {strides = array<i32>} : memref<8x1xf32, #tpu.memory_space<vmem>>, vector<8x1xf32>,
      %cst_24 = arith.constant 0.000000e+00 : f32
      %33 = vector.broadcast %cst_24 : f32 to vector<8x1xf32>
      %c0_25 = arith.constant 0 : index
      %c0_26 = arith.constant 0 : index
      %34 = vector.load %arg7[%c0_25, %c0_26] : memref<8x1xf32, #tpu.memory_space<vmem>>, vector<8x1xf32>
      tpu.vector_store %arg7[%c0_25, %c0_26], %33 {strides = array<i32>} : memref<8x1xf32, #tpu.memory_space<vmem>>, vector<8x1xf32>,
    } else {
    }
    %c0 = arith.constant 0 : index
    %c0_4 = arith.constant 0 : index
    %8 = vector.load %arg4[%c0, %c0_4] : memref<8x256xi8, #tpu.memory_space<vmem>>, vector<8x256xi8>
    %9 = arith.sitofp %8 : vector<8x256xi8> to vector<8x256xf32>
    %c0_5 = arith.constant 0 : index
    %c0_6 = arith.constant 0 : index
    %10 = vector.load %arg3[%c0_5, %c0_6] : memref<8x256xi8, #tpu.memory_space<vmem>>, vector<8x256xi8>
    %11 = arith.sitofp %10 : vector<8x256xi8> to vector<8x256xf32>
    %c0_7 = arith.constant 0 : index
    %c0_8 = arith.constant 0 : index
    %12 = vector.load %arg6[%c0_7, %c0_8] : memref<8x1xf32, #tpu.memory_space<vmem>>, vector<8x1xf32>
    %13 = arith.mulf %9, %11 : vector<8x256xf32>
    %cst = arith.constant dense<0.000000e+00> : vector<8xf32>
    %14 = vector.multi_reduction <add>, %13, %cst [1] : vector<8x256xf32> to vector<8xf32>
    %15 = vector.shape_cast %14 : vector<8xf32> to vector<8x1xf32>
    %16 = arith.addf %12, %15 : vector<8x1xf32>
    %c0_9 = arith.constant 0 : index
    %c0_10 = arith.constant 0 : index
    %17 = vector.load %arg6[%c0_9, %c0_10] : memref<8x1xf32, #tpu.memory_space<vmem>>, vector<8x1xf32>
    tpu.vector_store %arg6[%c0_9, %c0_10], %16 {strides = array<i32>} : memref<8x1xf32, #tpu.memory_space<vmem>>, vector<8x1xf32>,
    %c0_11 = arith.constant 0 : index
    %c0_12 = arith.constant 0 : index
    %18 = vector.load %arg7[%c0_11, %c0_12] : memref<8x1xf32, #tpu.memory_space<vmem>>, vector<8x1xf32>
    %cst_13 = arith.constant dense<0.000000e+00> : vector<8xf32>
    %19 = vector.multi_reduction <add>, %9, %cst_13 [1] : vector<8x256xf32> to vector<8xf32>
    %20 = vector.shape_cast %19 : vector<8xf32> to vector<8x1xf32>
    %21 = arith.addf %18, %20 : vector<8x1xf32>
    %c0_14 = arith.constant 0 : index
    %c0_15 = arith.constant 0 : index
    %22 = vector.load %arg7[%c0_14, %c0_15] : memref<8x1xf32, #tpu.memory_space<vmem>>, vector<8x1xf32>
    tpu.vector_store %arg7[%c0_14, %c0_15], %21 {strides = array<i32>} : memref<8x1xf32, #tpu.memory_space<vmem>>, vector<8x1xf32>,
    %c0_i32_16 = arith.constant 0 : i32
    %23 = arith.cmpi eq, %arg1, %c0_i32_16 : i32
    %24 = arith.extui %23 : i1 to i32
    %c0_i32_17 = arith.constant 0 : i32
    %25 = arith.cmpi ne, %24, %c0_i32_17 : i32
    scf.if %25 {
      %c0_21 = arith.constant 0 : index
      %c0_22 = arith.constant 0 : index
      %31 = vector.load %arg2[%c0_21, %c0_22] : memref<8x1xf32, #tpu.memory_space<vmem>>, vector<8x1xf32>
      %cst_23 = arith.constant 0.000000e+00 : f32
      %32 = vector.broadcast %cst_23 : f32 to vector<8x1xf32>
      %33 = arith.maximumf %31, %32 : vector<8x1xf32>
      %34 = math.absf %31 : vector<8x1xf32>
      %cst_24 = arith.constant 0.000000e+00 : f32
      %35 = vector.broadcast %cst_24 : f32 to vector<8x1xf32>
      %36 = arith.subf %35, %34 : vector<8x1xf32>
      %37 = math.exp %36 : vector<8x1xf32>
      %38 = math.log1p %37 : vector<8x1xf32>
      %39 = arith.subf %33, %31 : vector<8x1xf32>
      %40 = arith.addf %39, %38 : vector<8x1xf32>
      %41 = arith.addf %33, %38 : vector<8x1xf32>
      %cst_25 = arith.constant 0.000000e+00 : f32
      %42 = vector.broadcast %cst_25 : f32 to vector<8x1xf32>
      %43 = arith.subf %42, %40 : vector<8x1xf32>
      %44 = math.exp %43 : vector<8x1xf32>
      %cst_26 = arith.constant 0.000000e+00 : f32
      %45 = vector.broadcast %cst_26 : f32 to vector<8x1xf32>
      %46 = arith.subf %45, %41 : vector<8x1xf32>
      %47 = math.exp %46 : vector<8x1xf32>
      %cst_27 = arith.constant 1.000000e+00 : f32
      %48 = vector.broadcast %cst_27 : f32 to vector<8x1xf32>
      %49 = arith.subf %48, %44 : vector<8x1xf32>
      %50 = arith.mulf %49, %49 : vector<8x1xf32>
      %cst_28 = arith.constant 1.000000e+00 : f32
      %51 = vector.broadcast %cst_28 : f32 to vector<8x1xf32>
      %52 = arith.subf %51, %47 : vector<8x1xf32>
      %53 = arith.mulf %52, %52 : vector<8x1xf32>
      %54 = arith.mulf %50, %40 : vector<8x1xf32>
      %55 = arith.mulf %53, %41 : vector<8x1xf32>
      %c0_29 = arith.constant 0 : index
      %c0_30 = arith.constant 0 : index
      %56 = vector.load %arg6[%c0_29, %c0_30] : memref<8x1xf32, #tpu.memory_space<vmem>>, vector<8x1xf32>
      %c0_31 = arith.constant 0 : index
      %c0_32 = arith.constant 0 : index
      %57 = vector.load %arg7[%c0_31, %c0_32] : memref<8x1xf32, #tpu.memory_space<vmem>>, vector<8x1xf32>
      %c0_33 = arith.constant 0 : index
      %c0_34 = arith.constant 0 : index
      %58 = vector.load %arg8[%c0_33, %c0_34] : memref<8x1xf32, #tpu.memory_space<vmem>>, vector<8x1xf32>
      %59 = arith.mulf %54, %56 : vector<8x1xf32>
      %60 = arith.subf %57, %56 : vector<8x1xf32>
      %61 = arith.mulf %55, %60 : vector<8x1xf32>
      %62 = arith.addf %59, %61 : vector<8x1xf32>
      %63 = arith.addf %58, %62 : vector<8x1xf32>
      %c0_35 = arith.constant 0 : index
      %c0_36 = arith.constant 0 : index
      %64 = vector.load %arg8[%c0_35, %c0_36] : memref<8x1xf32, #tpu.memory_space<vmem>>, vector<8x1xf32>
      tpu.vector_store %arg8[%c0_35, %c0_36], %63 {strides = array<i32>} : memref<8x1xf32, #tpu.memory_space<vmem>>, vector<8x1xf32>,
      %c0_37 = arith.constant 0 : index
      %c0_38 = arith.constant 0 : index
      %65 = vector.load %arg9[%c0_37, %c0_38] : memref<8x1xf32, #tpu.memory_space<vmem>>, vector<8x1xf32>
      %66 = arith.addf %65, %57 : vector<8x1xf32>
      %c0_39 = arith.constant 0 : index
      %c0_40 = arith.constant 0 : index
      %67 = vector.load %arg9[%c0_39, %c0_40] : memref<8x1xf32, #tpu.memory_space<vmem>>, vector<8x1xf32>
      tpu.vector_store %arg9[%c0_39, %c0_40], %66 {strides = array<i32>} : memref<8x1xf32, #tpu.memory_space<vmem>>, vector<8x1xf32>,
    } else {
    }
    %c0_i32_18 = arith.constant 0 : i32
    %26 = arith.cmpi eq, %arg0, %c0_i32_18 : i32
    %c0_i32_19 = arith.constant 0 : i32
    %27 = arith.cmpi eq, %arg1, %c0_i32_19 : i32
    %28 = arith.andi %26, %27 : i1
    %29 = arith.extui %28 : i1 to i32
    %c0_i32_20 = arith.constant 0 : i32
    %30 = arith.cmpi ne, %29, %c0_i32_20 : i32
    scf.if %30 {
      %c0_21 = arith.constant 0 : index
      %c0_22 = arith.constant 0 : index
      %31 = vector.load %arg8[%c0_21, %c0_22] : memref<8x1xf32, #tpu.memory_space<vmem>>, vector<8x1xf32>
      %32 = vector.shape_cast %31 : vector<8x1xf32> to vector<1x8x1xf32>
      %cst_23 = arith.constant dense<0.000000e+00> : vector<1xf32>
      %33 = vector.multi_reduction <add>, %32, %cst_23 [1, 2] : vector<1x8x1xf32> to vector<1xf32>
      %34 = vector.shape_cast %33 : vector<1xf32> to vector<1x1x1xf32>
      %35 = vector.extract %34[0, 0, 0] : f32 from vector<1x1x1xf32>
      %36 = vector.broadcast %35 : f32 to vector<1x1xf32>
      %c0_24 = arith.constant 0 : index
      %c0_25 = arith.constant 0 : index
      %37 = vector.load %arg9[%c0_24, %c0_25] : memref<8x1xf32, #tpu.memory_space<vmem>>, vector<8x1xf32>
      %38 = vector.shape_cast %37 : vector<8x1xf32> to vector<1x8x1xf32>
      %cst_26 = arith.constant dense<0.000000e+00> : vector<1xf32>
      %39 = vector.multi_reduction <add>, %38, %cst_26 [1, 2] : vector<1x8x1xf32> to vector<1xf32>
      %40 = vector.shape_cast %39 : vector<1xf32> to vector<1x1x1xf32>
      %41 = vector.extract %40[0, 0, 0] : f32 from vector<1x1x1xf32>
      %42 = vector.broadcast %41 : f32 to vector<1x1xf32>
      %cst_27 = arith.constant 9.99999993E-9 : f32
      %43 = vector.broadcast %cst_27 : f32 to vector<1x1xf32>
      %44 = arith.addf %42, %43 : vector<1x1xf32>
      %45 = arith.divf %36, %44 : vector<1x1xf32>
      %c0_28 = arith.constant 0 : index
      %c0_29 = arith.constant 0 : index
      %46 = vector.load %arg5[%c0_28, %c0_29] : memref<1x1xf32, #tpu.memory_space<vmem>>, vector<1x1xf32>
      tpu.vector_store %arg5[%c0_28, %c0_29], %45 {strides = array<i32>} : memref<1x1xf32, #tpu.memory_space<vmem>>, vector<1x1xf32>,
    } else {
    }
    return
  }
  func.func @transform_0(%arg0: i32, %arg1: i32) -> (i32, i32) {
    %c0_i32 = arith.constant 0 : i32
    %c0_i32_0 = arith.constant 0 : i32
    return %arg0, %c0_i32 : i32, i32
  }
  func.func @transform_1(%arg0: i32, %arg1: i32) -> (i32, i32) {
    %c0_i32 = arith.constant 0 : i32
    return %arg0, %arg1 : i32, i32
  }
  func.func @transform_2(%arg0: i32, %arg1: i32) -> (i32, i32) {
    %c0_i32 = arith.constant 0 : i32
    return %arg0, %arg1 : i32, i32
  }
  func.func @transform_3(%arg0: i32, %arg1: i32) -> (i32, i32) {
    %c0_i32 = arith.constant 0 : i32
    %c0_i32_0 = arith.constant 0 : i32
    %c0_i32_1 = arith.constant 0 : i32
    return %c0_i32, %c0_i32_0 : i32, i32
  }
}

</mosaic_0001>

<bundles_post_ra>
// kernel: tpu_custom_call.1
= control target key start
LH: loop header
LB: loop body
LE: loop exit
PB: predicated region body
PF: predicated region fallthrough
CT: control target
= control target key end

     0   :  { %s227_s0 = inlined_call_operand.vmem [shape: f32[8,1], index: 0, kind: input, shape index: {}]   ;;  %s228_s1 = inlined_call_operand.vmem [shape: s8[8,256], index: 1, kind: input, shape index: {}]   ;;  %s229_s2 = inlined_call_operand.vmem [shape: s8[8,256], index: 2, kind: input, shape index: {}]   ;;  %s230_s3 = inlined_call_operand.hbm [shape: f32[1,1], index: 3, kind: output, shape index: {}]  }
   0x1   :  { %v30_v0 = vld [vmem:[%s229_s2] sm:$0xf] }
   0x2   :  { %v35_v1 = vld [vmem:[%s228_s1] sm:$0xf]  ;;  %v31_v2 = vunpack.c.0.s8 %v30_v0  ;;  %v32_v3 = vunpack.c.1.s8 %v30_v0 }
   0x3   :  { %v36_v4 = vunpack.c.0.s8 %v35_v1  ;;  %v37_v5 = vunpack.c.1.s8 %v35_v1 }
   0x4   :  { %8 = vsyncpa [#allocation7], 0  ;;  %v33_v6 = vcvt.s32.f32 %v31_v2  ;;  %v34_v7 = vcvt.s32.f32 %v32_v3  ;;  %vm21_vm0 = vcmask 7168   ;;  %v183_v14 = vmov 0.0   ;;  %v58_v15 = vld [vmem:[%s227_s0] sm:$0xff]  ;;  %s184_s17 = smov [#allocation6]  }
   0x5   :  { %v38_v8 = vcvt.s32.f32 %v36_v4  ;;  %v39_v9 = vcvt.s32.f32 %v37_v5  ;;  %22 = vst.msk [vmem:[#allocation4] sm:$0xff] %vm21_vm0, %v183_v14  ;;  %23 = vst.msk [vmem:[#allocation5] sm:$0xff] %vm21_vm0, %v183_v14  ;;  %v60_v16 = vand.u32 2147483647, %v58_v15  ;;  %v59_v25 = vmax.f32 %v58_v15, 0.0  ;;  %s137_s18 = sshll.u32 %s184_s17, 4  ;;  %s138_s18 = int_to_ptr.vmem [resolvable:$true] %s137_s18 }
   0x6   :  { %v50_v13 = vadd.f32 %v34_v7, %v33_v6  ;;  %28 = vst.msk [vmem:[#allocation2] sm:$0xff] %vm21_vm0, %v183_v14  ;;  %29 = vst.msk [vmem:[#allocation3] sm:$0xff] %vm21_vm0, %v183_v14  ;;  %vm129_vm2 = vcmask 0   ;;  %s161_s19 = scalar_lea.vmem %s138_s18, 16  ;;  %s165_s20 = scalar_lea.vmem %s138_s18, 32 }
   0x7   :  { %v41_v10 = vmul.f32 %v38_v8, %v33_v6  ;;  %v42_v11 = vmul.f32 %v39_v9, %v34_v7  ;;  %v61_v17 = vsub.f32 0.0, %v60_v16  ;;  %v73_v28 = vsub.f32 %v59_v25, %v58_v15  ;;  %p162_p0 = scmp.ne.s32.totalorder %s138_s18, %s161_s19  ;;  %p166_p1 = scmp.lt.s32.totalorder %s138_s18, %s138_s18 }
   0x8   :  { %p167_p2 = scmp.lt.s32.totalorder %s165_s20, %s161_s19 }
   0x9   :  { %v43_v12 = vadd.f32 %v42_v11, %v41_v10  ;;  %v62_v18 = vmul.f32 1.442695, %v61_v17 }
   0xa   :  { %p168_p3 = por %p167_p2, %p166_p1 }
   0xb   :  { %44 = vadd.xlane.f32.xlu0 %v43_v12  ;;  %151 = vpow2.f32 %v62_v18 }
   0xc   :  { %v97_v48 = vld [vmem:[#allocation5] sm:$0xff]  ;;  %v90_v57 = vld [vmem:[#allocation4] sm:$0xff]  ;;  %p169_p4 = pnand %p168_p3, %p162_p0 }
   0xd   :  { %v40_v36 = vld [vmem:[#allocation2] sm:$0xff]  ;;  %v49_v41 = vld [vmem:[#allocation3] sm:$0xff] }
   0xf   :  { %51 = vadd.xlane.f32.xlu0 %v50_v13 }
  0x18   :  { %v152_v19 = vpop.eup %151 }
  0x19   :  { %v64_v20 = vadd.f32 1.0, %v152_v19  ;;  %v67_v21 = vmul.f32 -0.5, %v152_v19  ;;  %v70_v24 = vand.u32 2147483647, %v152_v19 }
  0x1b   :  { %153 = vlog2.f32 %v64_v20  ;;  %v68_v22 = vadd.f32 1.0, %v67_v21  ;;  %vm71_vm1 = vcmp.lt.f32.partialorder %v70_v24, 0.0004427343 }
  0x1d   :  { %v69_v27 = vmul.f32 %v152_v19, %v68_v22 }
  0x28   :  { %v154_v23 = vpop.eup %153 }
  0x29   :  { %v66_v26 = vmul.f32 0.6931472, %v154_v23 }
  0x2b   :  { %v72_v29 = vsel %vm71_vm1, %v69_v27, %v66_v26 }
  0x2c   :  { %v74_v30 = vadd.f32 %v73_v28, %v72_v29  ;;  %v75_v31 = vadd.f32 %v72_v29, %v59_v25 }
  0x2e   :  { %v76_v32 = vsub.f32 0.0, %v74_v30  ;;  %v79_v33 = vsub.f32 0.0, %v75_v31 }
  0x30   :  { %v77_v34 = vmul.f32 1.442695, %v76_v32  ;;  %v80_v35 = vmul.f32 1.442695, %v79_v33 }
  0x32   :  { %155 = vpow2.f32 %v77_v34 }
  0x33   :  { %157 = vpow2.f32 %v80_v35 }
  0x3f   :  { %v156_v38 = vpop.eup %155 }
  0x40   :  { %v158_v40 = vpop.eup %157  ;;  %v82_v43 = vsub.f32 1.0, %v156_v38 }
  0x41   :  { %v84_v44 = vsub.f32 1.0, %v158_v40 }
  0x42   :  { %v83_v46 = vmul.f32 %v82_v43, %v82_v43 }
  0x43   :  { %v85_v47 = vmul.f32 %v84_v44, %v84_v44 }
  0x44   :  { %v86_v49 = vmul.f32 %v83_v46, %v74_v30 }
  0x45   :  { %v87_v50 = vmul.f32 %v85_v47, %v75_v31 }
  0x94   :  { %v45_v37 = vpop.xlane.xlu0 %44 }
  0x95   :  { %v46_v39 = vadd.f32 %v45_v37, %v40_v36 }
  0x97   :  { %48 = vst.msk [vmem:[#allocation2] sm:$0xff] %vm21_vm0, %v46_v39 }
  0x98   :  { %v52_v42 = vpop.xlane.xlu0 %51 }
  0x99   :  { %v53_v45 = vadd.f32 %v52_v42, %v49_v41 }
  0x9b   :  { %54 = vst.msk [vmem:[#allocation3] sm:$0xff] %vm21_vm0, %v53_v45 }
  0x9e   :  { %v88_v51 = vld [vmem:[#allocation2] sm:$0xff] }
  0x9f   :  { %v91_v55 = vmul.f32 %v88_v51, %v86_v49 }
  0xa2   :  { %v89_v52 = vld [vmem:[#allocation3] sm:$0xff] }
  0xa3   :  { %v92_v53 = vsub.f32 %v89_v52, %v88_v51  ;;  %v98_v54 = vadd.f32 %v97_v48, %v89_v52 }
  0xa5   :  { %v93_v56 = vmul.f32 %v92_v53, %v87_v50  ;;  %99 = vst.msk [vmem:[#allocation5] sm:$0xff] %vm21_vm0, %v98_v54 }
  0xa7   :  { %v94_v58 = vadd.f32 %v93_v56, %v91_v55 }
  0xa9   :  { %v95_v59 = vadd.f32 %v94_v58, %v90_v57 }
  0xab   :  { %96 = vst.msk [vmem:[#allocation4] sm:$0xff] %vm21_vm0, %v95_v59 }
  0xac   :  { %v114_v62 = vld [vmem:[#allocation5] sm:$0xff] }
  0xad   :  { %v115_v63 = vsel %vm21_vm0, %v114_v62, 0.0 }
  0xb2   :  { %v102_v60 = vld [vmem:[#allocation4] sm:$0xff] }
  0xb3   :  { %v103_v61 = vsel %vm21_vm0, %v102_v60, 0.0 }
  0xb4   :  { %104 = vadd.xlane.f32.xlu1 %v103_v61 }
  0xb8   :  { %116 = vadd.xlane.f32.xlu1 %v115_v63 }
 0x13d   :  { %v105_v0 = vpop.xlane.xlu1 %104 }
 0x13e   :  { %v106_v1 = vrot.slane %v105_v0, 4 }
 0x140   :  { %v107_v2 = vadd.f32 %v106_v1, %v105_v0 }
 0x141   :  { %v117_v3 = vpop.xlane.xlu1 %116 }
 0x142   :  { %v108_v4 = vrot.slane %v107_v2, 2  ;;  %v118_v5 = vrot.slane %v117_v3, 4 }
 0x144   :  { %v119_v6 = vadd.f32 %v118_v5, %v117_v3  ;;  %v109_v7 = vadd.f32 %v108_v4, %v107_v2 }
 0x146   :  { %v120_v8 = vrot.slane %v119_v6, 2  ;;  %v110_v9 = vrot.slane %v109_v7, 1 }
 0x148   :  { %v121_v10 = vadd.f32 %v120_v8, %v119_v6  ;;  %v111_v11 = vadd.f32 %v110_v9, %v109_v7 }
 0x14a   :  { %145 = vpush %v111_v11  ;;  %v122_v12 = vrot.slane %v121_v10, 1 }
 0x14c   :  { %v123_v13 = vadd.f32 %v122_v12, %v121_v10 }
 0x14e   :  { %147 = vpush %v123_v13 }
 0x17b   :  { %s146_s0 = spop %145 }
 0x17c   :  { %v113_v17 = vstv %s146_s0 }
 0x17f   :  { %s148_s16 = spop %147 }
 0x180   :  { %v125_v14 = vstv %s148_s16 }
 0x181   :  { %v126_v15 = vadd.f32 1e-08, %v125_v14 }
 0x183   :  { %159 = vrcp.f32 %v126_v15 }
 0x190   :  { %v160_v16 = vpop.eup %159 }
 0x191   :  { %v128_v18 = vmul.f32 %v160_v16, %v113_v17 }
 0x193   :  { %130 = vst.msk [vmem:[#allocation6] sm:$0x1] %vm129_vm2, %v128_v18 }
 0x194   :  { %172 = shalt.err (!%p169_p4)
}
 0x195   :  { %140 = dma.vmem_to_hbm [thread:$0]  %s138_s18, 16, %s230_s3, [#allocation7]  }
 0x196   :  { %181 = dma.done.wait [#allocation7], 16  }
 0x197   :  { %182 = vsyncadd [#allocation7], 4294967280 }
 0x198   :  { %144 = vsyncpa [#allocation7], 1 }

</bundles_post_ra>
